<compile_context>
chip_gen: v7x
topology: tpu7x:2x2x1
jax: 0.10.0
libtpu: 0.0.40
codegen_flags: <defaults>
</compile_context>

<pallas_src>
import functools

import jax
import jax.numpy as jnp
from jax.experimental import pallas as pl
from jax.experimental.pallas import tpu as pltpu


def _sphere_conv_kernel(x_ref, w_ref, shift_ref, o_ref, *, compute_dtype):
    # x_ref:     (1, C_in, tl)   NCL input block, f32 in HBM/VMEM
    # w_ref:     (C_out, C_in)   scale-folded conv weight (compute dtype)
    # shift_ref: (C_out, 1)      folded BN shift (f32)
    # o_ref:     (1, C_out, tl)  NCL output block (out dtype), lane-dense
    x = x_ref[0].astype(compute_dtype)  # in-kernel cast: free VPU work
    y = jnp.dot(w_ref[...], x, preferred_element_type=jnp.float32)
    y = y + shift_ref[...]
    o_ref[0] = jnp.maximum(y, 0.0).astype(o_ref.dtype)


def _num_tensorcores_per_chip():
    """2 on v7x (two TensorCores/chip), 1 on v5e/v6e. Best-effort detection."""
    try:
        kind = jax.devices()[0].device_kind.lower()
        if "v7" in kind or "7x" in kind:
            return 2
    except Exception:
        pass
    return 1


def _pick_tl(L, max_tl):
    """Largest lane tile <= max_tl that is a multiple of 128 and divides L."""
    if L % 128 != 0:
        return L  # full-extent block along L is always legal
    tl = min(max_tl, L)
    tl -= tl % 128
    tl = max(tl, 128)
    while L % tl != 0:
        tl -= 128
    return tl


@functools.partial(
    jax.jit, static_argnames=("max_tl", "compute_dtype", "out_dtype"))
def sphere_conv_forward(x_ncl, weight, gamma, beta, running_mean, running_var,
                        eps=1e-5, max_tl=2048, compute_dtype=jnp.bfloat16,
                        out_dtype=jnp.bfloat16):
    """x_ncl: (N, C_in, L) f32.  weight: (C_out, C_in) (k=1 Conv1d, no bias)."""
    N, C_in, L = x_ncl.shape
    C_out = weight.shape[0]

    # Fold eval-mode BatchNorm into per-output-channel scale / shift, then fold
    # the scale into the conv weight (kernel only applies the shift).
    scale = gamma / jnp.sqrt(running_var + eps)               # (C_out,)
    shift = (beta - running_mean * scale).reshape(C_out, 1)   # (C_out, 1) f32
    w_scaled = (weight * scale[:, None]).astype(compute_dtype)  # (C_out, C_in)

    x_itemsize = x_ncl.dtype.itemsize
    out_itemsize = jnp.dtype(out_dtype).itemsize
    w_itemsize = jnp.dtype(compute_dtype).itemsize

    num_tc = _num_tensorcores_per_chip()
    is_v7x = num_tc >= 2

    # --- Lane tile selection ---------------------------------------------
    tl = _pick_tl(L, max_tl)

    # Keep double-buffered (x + out) blocks comfortably inside VMEM
    # (conservative bound valid even for v7x's 64 MiB).
    def _block_bytes(t):
        return 2 * (C_in * t * x_itemsize + C_out * t * out_itemsize)

    while L % 128 == 0 and tl > 128 and _block_bytes(tl) > 24 * 1024 * 1024:
        tl = _pick_tl(L, tl - 128)

    # Only on v7x (2 TCs) is it worth shrinking the tile to expose >= 2
    # parallel grid blocks; on single-TC v5e/v6e this is pure overhead.
    if is_v7x and N * (L // tl) < num_tc and tl > 128 and L % 128 == 0:
        tl = _pick_tl(L, max(tl // 2, 128))

    grid = (N, L // tl)

    # --- VMEM limit (generation-aware) -------------------------------------
    w_vmem = (C_out * max(C_in, 128) * w_itemsize) + (C_out * 128 * 4)
    need = _block_bytes(tl) + 2 * w_vmem + (2 << 20)
    vmem_cap = (48 if is_v7x else 64) * 1024 * 1024
    vmem_limit = int(min(max(need, 32 * 1024 * 1024), vmem_cap))

    cost = pl.CostEstimate(
        flops=2 * N * L * C_in * C_out,
        transcendentals=0,
        bytes_accessed=int(N * C_in * L * x_itemsize
                           + C_out * C_in * w_itemsize
                           + C_out * 4
                           + N * C_out * L * out_itemsize),
    )

    kernel = functools.partial(_sphere_conv_kernel, compute_dtype=compute_dtype)

    out = pl.pallas_call(
        kernel,
        out_shape=jax.ShapeDtypeStruct((N, C_out, L), out_dtype),
        grid_spec=pltpu.PrefetchScalarGridSpec(
            num_scalar_prefetch=0,
            grid=grid,
            in_specs=[
                pl.BlockSpec((1, C_in, tl), lambda n, l: (n, 0, l)),
                pl.BlockSpec((C_out, C_in), lambda n, l: (0, 0)),
                pl.BlockSpec((C_out, 1), lambda n, l: (0, 0)),
            ],
            out_specs=pl.BlockSpec((1, C_out, tl), lambda n, l: (n, 0, l)),
        ),
        compiler_params=pltpu.CompilerParams(
            dimension_semantics=("parallel", "parallel"),
            vmem_limit_bytes=vmem_limit,
        ),
        cost_estimate=cost,
    )(x_ncl, w_scaled, shift)

    return out


def _reference_forward(x_ncl, weight, gamma, beta, running_mean, running_var,
                       eps=1e-5):
    # Pure-JAX f32 reference: conv1d(k=1, no bias) + eval BN + ReLU.
    y = jnp.einsum("ncl,oc->nol", x_ncl, weight)
    inv_std = 1.0 / jnp.sqrt(running_var + eps)
    y = (y - running_mean[None, :, None]) * inv_std[None, :, None]
    y = y * gamma[None, :, None] + beta[None, :, None]
    return jnp.maximum(y, 0.0)


if __name__ == "__main__":
    N, C_in, C_out, L = 2, 32, 64, 512

    key = jax.random.PRNGKey(0)
    k_x, k_w = jax.random.split(key)

    x = jax.random.normal(k_x, (N, C_in, L), dtype=jnp.float32)

    # Conv1d weight (C_out, C_in, 1) -> (C_out, C_in); Kaiming normal,
    # mode='fan_out', nonlinearity='relu': std = sqrt(2 / (C_out * k)).
    std = (2.0 / (C_out * 1)) ** 0.5
    weight = std * jax.random.normal(k_w, (C_out, C_in), dtype=jnp.float32)

    # BatchNorm1d defaults (eval mode).
    gamma = jnp.ones((C_out,), jnp.float32)
    beta = jnp.zeros((C_out,), jnp.float32)
    running_mean = jnp.zeros((C_out,), jnp.float32)
    running_var = jnp.ones((C_out,), jnp.float32)

    out = sphere_conv_forward(x, weight, gamma, beta, running_mean, running_var)
    out = jax.block_until_ready(out)

    ref = _reference_forward(x, weight, gamma, beta, running_mean, running_var)
    assert out.shape == (N, C_out, L)
    # bf16 compute + bf16 output vs f32 reference -> loosened tolerance.
    out_f32 = out.astype(jnp.float32)
    max_err = float(jnp.max(jnp.abs(out_f32 - ref)))
    assert jnp.allclose(out_f32, ref, atol=5e-2, rtol=5e-2), max_err

    print("KERNEL_OK")
</pallas_src>

<mosaic_0001>
module attributes {stable_mosaic.version = 11 : i64} {
  func.func @_sphere_conv_kernel(%arg0: i32, %arg1: i32, %arg2: memref<1x32x512xf32, #tpu.memory_space<vmem>>, %arg3: memref<64x32xbf16, #tpu.memory_space<vmem>>, %arg4: memref<64x1xf32, #tpu.memory_space<vmem>>, %arg5: memref<1x64x512xbf16, #tpu.memory_space<vmem>>) attributes {dimension_semantics = [#tpu.dimension_semantics<parallel>, #tpu.dimension_semantics<parallel>], iteration_bounds = array<i64: 2, 1>, scalar_prefetch = 0 : i64, scratch_operands = 0 : i64, tpu.core_type = #tpu.core_type<tc>, window_params = [{transform_indices = @transform_0, window_bounds = array<i64: 1, 32, 512>}, {pipeline_mode = #tpu.pipeline_mode<synchronous>, transform_indices = @transform_1, window_bounds = array<i64: 64, 32>}, {pipeline_mode = #tpu.pipeline_mode<synchronous>, transform_indices = @transform_2, window_bounds = array<i64: 64, 1>}, {transform_indices = @transform_3, window_bounds = array<i64: 1, 64, 512>}]} {
    %c0 = arith.constant 0 : index
    %c0_0 = arith.constant 0 : index
    %c0_1 = arith.constant 0 : index
    %0 = vector.load %arg2[%c0, %c0_0, %c0_1] : memref<1x32x512xf32, #tpu.memory_space<vmem>>, vector<1x32x512xf32>
    %1 = vector.shape_cast %0 : vector<1x32x512xf32> to vector<32x512xf32>
    %2 = arith.truncf %1 : vector<32x512xf32> to vector<32x512xbf16>
    %c0_2 = arith.constant 0 : index
    %c0_3 = arith.constant 0 : index
    %3 = vector.load %arg3[%c0_2, %c0_3] : memref<64x32xbf16, #tpu.memory_space<vmem>>, vector<64x32xbf16>
    %cst = arith.constant dense<0.000000e+00> : vector<64x512xf32>
    %4 = tpu.matmul %3, %2, %cst {dimension_numbers = #tpu.dot_dimension_numbers<[1], [0], [0], [1], [0, 0, 1, 1], [], []>} : vector<64x32xbf16>, vector<32x512xbf16>, vector<64x512xf32> -> vector<64x512xf32>
    %c0_4 = arith.constant 0 : index
    %c0_5 = arith.constant 0 : index
    %5 = vector.load %arg4[%c0_4, %c0_5] : memref<64x1xf32, #tpu.memory_space<vmem>>, vector<64x1xf32>
    %6 = vector.broadcast %5 : vector<64x1xf32> to vector<64x512xf32>
    %7 = arith.addf %4, %6 : vector<64x512xf32>
    %cst_6 = arith.constant 0.000000e+00 : f32
    %8 = vector.broadcast %cst_6 : f32 to vector<64x512xf32>
    %9 = arith.maximumf %7, %8 : vector<64x512xf32>
    %10 = arith.truncf %9 : vector<64x512xf32> to vector<64x512xbf16>
    %c0_7 = arith.constant 0 : index
    %c0_8 = arith.constant 0 : index
    %c0_9 = arith.constant 0 : index
    %11 = vector.load %arg5[%c0_7, %c0_8, %c0_9] : memref<1x64x512xbf16, #tpu.memory_space<vmem>>, vector<1x64x512xbf16>
    %12 = vector.shape_cast %11 : vector<1x64x512xbf16> to vector<64x512xbf16>
    %13 = vector.shape_cast %10 : vector<64x512xbf16> to vector<1x64x512xbf16>
    tpu.vector_store %arg5[%c0_7, %c0_8, %c0_9], %13 {strides = array<i32>} : memref<1x64x512xbf16, #tpu.memory_space<vmem>>, vector<1x64x512xbf16>,
    return
  }
  func.func @transform_0(%arg0: i32, %arg1: i32) -> (i32, i32, i32) {
    %c0_i32 = arith.constant 0 : i32
    %c0_i32_0 = arith.constant 0 : i32
    return %arg0, %c0_i32, %arg1 : i32, i32, i32
  }
  func.func @transform_1(%arg0: i32, %arg1: i32) -> (i32, i32) {
    %c0_i32 = arith.constant 0 : i32
    %c0_i32_0 = arith.constant 0 : i32
    %c0_i32_1 = arith.constant 0 : i32
    return %c0_i32, %c0_i32_0 : i32, i32
  }
  func.func @transform_2(%arg0: i32, %arg1: i32) -> (i32, i32) {
    %c0_i32 = arith.constant 0 : i32
    %c0_i32_0 = arith.constant 0 : i32
    %c0_i32_1 = arith.constant 0 : i32
    return %c0_i32, %c0_i32_0 : i32, i32
  }
  func.func @transform_3(%arg0: i32, %arg1: i32) -> (i32, i32, i32) {
    %c0_i32 = arith.constant 0 : i32
    %c0_i32_0 = arith.constant 0 : i32
    return %arg0, %c0_i32, %arg1 : i32, i32, i32
  }
}

</mosaic_0001>

<bundles_post_ra>
// kernel: sphere_conv_forward.1
= control target key start
LH: loop header
LB: loop body
LE: loop exit
PB: predicated region body
PF: predicated region fallthrough
CT: control target
= control target key end

     0   :  { %8 = vsyncpa [#allocation3], 0  ;;  %s1136_s0 = inlined_call_operand.vmem [shape: f32[2,32,512], index: 0, kind: input, shape index: {}]   ;;  %s1137_s1 = inlined_call_operand.vmem [shape: bf16[64,32], index: 1, kind: input, shape index: {}]   ;;  %s1138_s2 = inlined_call_operand.vmem [shape: f32[64,1], index: 2, kind: input, shape index: {}]   ;;  %s1139_s3 = inlined_call_operand.hbm [shape: bf16[2,64,512], index: 3, kind: output, shape index: {}]  }
   0x1   :  { %10 = vsyncpa [#allocation3 + $0x1], 0  ;;  %s926_s12 = smov 0   ;;  %s928_s13 = smov 0  }
   0x2   :  { %s930_s14 = smov 0   ;;  %s932_s15 = smov 0  }
   0x3   :  { %s934_s16 = smov 0   ;;  %s936_s17 = smov 0  }
   0x4 LB: > { %s699_s18 = sadd.s32 4294967295, %s900_s17   ;;  %s700_s19 = sadd.s32 4294967294, %s900_s17   ;;  %s900_s17 = sphi %s936_s17, %s16_s17   ;;  %s896_s16 = sphi %s934_s16, %s1146_s16   ;;  %s892_s15 = sphi %s932_s15, %s1145_s15   ;;  %s888_s14 = sphi %s930_s14, %s1144_s14   ;;  %s884_s13 = sphi %s928_s13, %s1143_s13   ;;  %s880_s12 = sphi %s926_s12, %s1142_s12  }
   0x5   : > { %s28_s20 = sadd.s32 1, %s896_s16  ;;  %s107_s21 = sadd.s32 1, %s888_s14 }
   0x6   : > { %p30_p0 = scmp.ge.s32.totalorder %s28_s20, 2  ;;  %p117_p1 = scmp.ne.s32.totalorder %s888_s14, %s884_s13 }
   0x7   : > { %p118_p2 = scmp.eq.s32.totalorder %s699_s18, 1  ;;  %p123_p3 = scmp.ne.s32.totalorder %s884_s13, %s880_s12 }
   0x8   : > { %s1148_s20 = smov (%p30_p0, %s28_s20), 0  ;;  %p124_p5 = scmp.eq.s32.totalorder %s700_s19, 1 }
   0x9   : > { %p966_p4 = por %p118_p2, %p117_p1  ;;  %s102_s23 = ssub.s32 %s896_s16, %s1148_s20 }
   0xa   : > { %p703_p6 = scmp.ge.s32.totalorder %s900_s17, 1  ;;  %p105_p7 = scmp.eq.s32.totalorder %s102_s23, 0 }
   0xb   : > { %p973_p8 = por %p124_p5, %p123_p3  ;;  %p161_p9 = scmp.lt.s32.totalorder %s900_s17, 3 }
   0xc   : > { %s979_s25 = scalar_select %p105_p7, %s888_s14, %s107_s21  }
   0xd   : > { %p162_p10 = pnand %p703_p6, %p161_p9 }
   0xe   : > { %p190_p11 = scmp.lt.s32.totalorder (!%p162_p10), %s892_s15, 1  ;;  %v902_v0 = vmov (!%p162_p10), 0   ;;  %v233_v1 = vld [vmem:[%s1138_s2] sm:$0xff] (!%p162_p10)  ;;  %v234_v2 = vld [vmem:[%s1138_s2 + $0x8] sm:$0xff] (!%p162_p10)  ;;  %v235_v3 = vld [vmem:[%s1138_s2 + $0x10] sm:$0xff] (!%p162_p10)  ;;  %vm301_vm0 = vcmask (!%p162_p10), 261120  }
   0xf   : > { %165 = sbr.rel (%p162_p10) target bundleno = 299 (0x12b), region = 32  ;;  %346 = vmatprep.mubr.bf16.mxu0 (!%p162_p10), %v902_v0  ;;  %419 = vmatprep.mubr.bf16.mxu1 (!%p162_p10), %v902_v0  ;;  %v236_v7 = vld [vmem:[%s1138_s2 + $0x18] sm:$0xff] (!%p162_p10)  ;;  %v237_v28 = vld [vmem:[%s1138_s2 + $0x20] sm:$0xff] (!%p162_p10)  ;;  %v238_v30 = vld [vmem:[%s1138_s2 + $0x28] sm:$0xff] (!%p162_p10)  ;;  %s186_s11 = sand.u32 (!%p162_p10), 1, %s884_s13  }
  0x10   : > { %816 = vset.pattern.permute.xlu0 (!%p162_p10), %v902_v0  ;;  %817 = vset.pattern.permute.xlu1 (!%p162_p10), %v902_v0  ;;  %v818_v31 = vld [vmem:[%s1137_s1] sm:$0xff] (!%p162_p10)   ;;  %v239_v32 = vld [vmem:[%s1138_s2 + $0x30] sm:$0xff] (!%p162_p10)  ;;  %v240_v33 = vld [vmem:[%s1138_s2 + $0x38] sm:$0xff] (!%p162_p10)  ;;  %s704_s18 = sshll.u32 (!%p162_p10), %s186_s11, 7  ;;  %s757_s21 = sshll.u32 (!%p162_p10), %s892_s15, 11 }
  0x11   : > { %243 = vperm.xlu0 (!%p162_p10), %816, %v233_v1   ;;  %253 = vperm.xlu1 (!%p162_p10), %817, %v235_v3   ;;  %v819_v34 = vld [vmem:[%s1137_s1 + $0x8] sm:$0xff] (!%p162_p10)   ;;  %v820_v35 = vld [vmem:[%s1137_s1 + $0x10] sm:$0xff] (!%p162_p10)   ;;  %v821_v36 = vld [vmem:[%s1137_s1 + $0x18] sm:$0xff] (!%p162_p10)   ;;  %s1061_s19 = scalar_lea.vmem (!%p162_p10), [#allocation2], %s704_s18  ;;  %s1081_s28 = scalar_lea.hbm (!%p162_p10), %s1139_s3, %s757_s21 }
  0x12   : > { %s620_s23 = sshll.u32 (!%p162_p10), %s1061_s19, 4  ;;  %s903_s30 = smov (!%p162_p10), [#allocation2]   ;;  %s1083_s23 = int_to_ptr.vmem [resolvable:$true] %s620_s23 }
  0x13   : > { %s822_s29 = scalar_lea.vmem (!%p162_p10), %s1083_s23, 2048  ;;  %s826_s4 = sshll.u32 (!%p162_p10), %s903_s30, 4  ;;  %s827_s4 = int_to_ptr.vmem [resolvable:$false] %s826_s4 }
  0x14   : > { %p823_p12 = scmp.ne.s32.totalorder (!%p162_p10), %s1083_s23, %s822_s29  ;;  %p829_p1 = scmp.lt.s32.totalorder (!%p162_p10), %s1083_s23, %s827_s4 }
  0x15   : > { %248 = vperm.xlu0 (!%p162_p10), %816, %v234_v2   ;;  %258 = vperm.xlu1 (!%p162_p10), %817, %v236_v7  }
  0x16   : > { %s191_s26 = scalar_select %p190_p11, %s892_s15, 1 }
  0x17   : > { %s1090_s15 = scalar_lea.sflag [#allocation3], %s186_s11  ;;  %p824_p13 = pnand %p823_p12, %p966_p4 }
  0x18   : > { %s740_s27 = sshll.u32 %s191_s26, 7 }
  0x19   : > { %s993_s5 = scalar_lea.vmem %s1136_s0, %s740_s27  ;;  %263 = vperm.xlu0 %816, %v237_v28   ;;  %268 = vperm.xlu1 %817, %v238_v30   ;;  %p825_p0 = pneg %p824_p13 }
  0x1a   : > { %v202_v4 = vld [vmem:[%s993_s5 + $0x8] sm:$0xff]  ;;  %v204_v6 = vld [vmem:[%s993_s5 + $0x18] sm:$0xff]  ;;  %v201_v10 = vld [vmem:[%s993_s5] sm:$0xff] }
  0x1b   : > { %v206_v5 = vld [vmem:[%s993_s5 + $0x28] sm:$0xff]  ;;  %v208_v9 = vld [vmem:[%s993_s5 + $0x38] sm:$0xff]  ;;  %v205_v11 = vld [vmem:[%s993_s5 + $0x20] sm:$0xff] }
  0x1c   : > { %v218_v8 = vpack.c.bf16 %v206_v5, %v202_v4  ;;  %v220_v12 = vpack.c.bf16 %v208_v9, %v204_v6  ;;  %v217_v13 = vpack.c.bf16 %v205_v11, %v201_v10  ;;  %v203_v14 = vld [vmem:[%s993_s5 + $0x10] sm:$0xff]  ;;  %v210_v16 = vld [vmem:[%s993_s5 + $0x48] sm:$0xff]  ;;  %v212_v19 = vld [vmem:[%s993_s5 + $0x58] sm:$0xff] }
  0x1d   : > { %v207_v15 = vld [vmem:[%s993_s5 + $0x30] sm:$0xff]  ;;  %v214_v18 = vld [vmem:[%s993_s5 + $0x68] sm:$0xff]  ;;  %v216_v20 = vld [vmem:[%s993_s5 + $0x78] sm:$0xff]  ;;  %273 = vperm.xlu0 %816, %v239_v32   ;;  %278 = vperm.xlu1 %817, %v240_v33  }
  0x1e   : > { %314 = vmatprep.subr.bf16.mxu0 %v218_v8  ;;  %v219_v17 = vpack.c.bf16 %v207_v15, %v203_v14  ;;  %387 = vmatprep.subr.bf16.mxu1 %v220_v12  ;;  %v222_v21 = vpack.c.bf16 %v214_v18, %v210_v16  ;;  %v224_v22 = vpack.c.bf16 %v216_v20, %v212_v19  ;;  %v209_v23 = vld [vmem:[%s993_s5 + $0x40] sm:$0xff]  ;;  %v211_v25 = vld [vmem:[%s993_s5 + $0x50] sm:$0xff] }
  0x1f   : > { %315 = vmatpush1.bf16.msra.mxu0 %v217_v13  ;;  %v213_v24 = vld [vmem:[%s993_s5 + $0x60] sm:$0xff]  ;;  %v215_v27 = vld [vmem:[%s993_s5 + $0x70] sm:$0xff]  ;;  %s828_s5 = scalar_lea.vmem %s827_s4, 4096 }
  0x20   : > { %388 = vmatpush1.bf16.msra.mxu1 %v219_v17  ;;  %v221_v26 = vpack.c.bf16 %v213_v24, %v209_v23  ;;  %316 = vmatprep.subr.bf16.mxu0 %v222_v21  ;;  %v223_v29 = vpack.c.bf16 %v215_v27, %v211_v25  ;;  %p830_p2 = scmp.lt.s32.totalorder %s828_s5, %s822_s29 }
  0x21   : > { %389 = vmatprep.subr.bf16.mxu1 %v224_v22 }
  0x22   : > { %p831_p3 = por %p830_p2, %p829_p1 }
  0x23   : > { %317 = vmatpush1.bf16.msra.mxu0 %v221_v26 }
  0x24   : > { %390 = vmatpush1.bf16.msra.mxu1 %v223_v29  ;;  %p832_p5 = pnand %p831_p3, %p825_p0 }
  0x26   : > { %711 = vmatmul.mubr.msk.bf16.vlgmr.msra.gmra.mrb[0].mxu0 %vm301_vm0, %v818_v31 }
  0x27   : > { %715 = vmatmul.mubr.msk.bf16.vlgmr.msra.gmra.mrb[0].mxu1 %vm301_vm0, %v818_v31  ;;  %356 = vmatprep.mubr.bf16.mxu0 %v902_v0 }
  0x28   : > { %429 = vmatprep.mubr.bf16.mxu1 %v902_v0 }
  0x2e   : > { %712 = vmatmul.mubr.msk.bf16.gmra.mrb[4].mxu0 %vm301_vm0, %v819_v34 }
  0x2f   : > { %716 = vmatmul.mubr.msk.bf16.gmra.mrb[4].mxu1 %vm301_vm0, %v819_v34  ;;  %366 = vmatprep.mubr.bf16.mxu0 %v902_v0 }
  0x30   : > { %439 = vmatprep.mubr.bf16.mxu1 %v902_v0 }
  0x36   : > { %713 = vmatmul.mubr.msk.bf16.gmra.mrb[8].mxu0 %vm301_vm0, %v820_v35 }
  0x37   : > { %717 = vmatmul.mubr.msk.bf16.gmra.mrb[8].mxu1 %vm301_vm0, %v820_v35  ;;  %376 = vmatprep.mubr.bf16.mxu0 %v902_v0 }
  0x38   : > { %449 = vmatprep.mubr.bf16.mxu1 %v902_v0 }
  0x3e   : > { %714 = vmatmul.mubr.msk.bf16.gmra.mrb[12].mxu0 %vm301_vm0, %v821_v36 }
  0x3f   : > { %718 = vmatmul.mubr.msk.bf16.gmra.mrb[12].mxu1 %vm301_vm0, %v821_v36 }
  0x90   : > { %v244_v37 = vpop.permute.xlu0 %243  ;;  %v254_v38 = vpop.permute.xlu1 %253 }
  0x94   : > { %v249_v40 = vpop.permute.xlu0 %248  ;;  %v259_v3 = vpop.permute.xlu1 %258 }
  0x98   : > { %v264_v30 = vpop.permute.xlu0 %263  ;;  %v269_v32 = vpop.permute.xlu1 %268 }
  0xf9   : > { %v348_v39 = vpop.f32.mrb[0].mxu0 }
  0xfa   : > { %v349_v41 = vadd.f32 %v348_v39, %v244_v37  ;;  %v421_v42 = vpop.f32.mrb[0].mxu1  ;;  %v350_v43 = vpop.f32.mrb[1].mxu0 }
  0xfb   : > { %v422_v44 = vadd.f32 %v421_v42, %v244_v37  ;;  %v351_v45 = vadd.f32 %v350_v43, %v244_v37  ;;  %v423_v46 = vpop.f32.mrb[1].mxu1  ;;  %v352_v47 = vpop.f32.mrb[2].mxu0 }
  0xfc   : > { %v460_v48 = vmax.f32 %v349_v41, 0.0  ;;  %v424_v49 = vadd.f32 %v423_v46, %v244_v37  ;;  %v353_v50 = vadd.f32 %v352_v47, %v249_v40  ;;  %v425_v51 = vpop.f32.mrb[2].mxu1  ;;  %v354_v52 = vpop.f32.mrb[3].mxu0 }
  0xfd   : > { %v462_v53 = vmax.f32 %v422_v44, 0.0  ;;  %v461_v54 = vmax.f32 %v351_v45, 0.0  ;;  %v426_v55 = vadd.f32 %v425_v51, %v249_v40  ;;  %v355_v56 = vadd.f32 %v354_v52, %v249_v40  ;;  %v427_v57 = vpop.f32.mrb[3].mxu1 }
  0xfe   : > { %v463_v58 = vmax.f32 %v424_v49, 0.0  ;;  %v464_v59 = vmax.f32 %v353_v50, 0.0  ;;  %v428_v60 = vadd.f32 %v427_v57, %v249_v40 }
  0xff   : > { %v741_v61 = vpack.c.bf16 %v461_v54, %v460_v48  ;;  %v466_v62 = vmax.f32 %v426_v55, 0.0  ;;  %v465_v63 = vmax.f32 %v355_v56, 0.0 }
 0x100   : > { %v742_v0 = vpack.c.bf16 %v463_v58, %v462_v53  ;;  %v467_v1 = vmax.f32 %v428_v60, 0.0 }
 0x101   : > { %588 = vst [vmem:[%s1061_s19] sm:$0xff] %v741_v61  ;;  %v743_v2 = vpack.c.bf16 %v465_v63, %v464_v59  ;;  %v358_v4 = vpop.f32.mrb[4].mxu0  ;;  %v274_v59 = vpop.permute.xlu0 %273 }
 0x102   : > { %589 = vst [vmem:[%s1061_s19 + $0x8] sm:$0xff] %v742_v0  ;;  %v744_v5 = vpack.c.bf16 %v467_v1, %v466_v62  ;;  %v359_v6 = vadd.f32 %v358_v4, %v254_v38  ;;  %v431_v7 = vpop.f32.mrb[4].mxu1  ;;  %v360_v8 = vpop.f32.mrb[5].mxu0 }
 0x103   : > { %590 = vst [vmem:[%s1061_s19 + $0x10] sm:$0xff] %v743_v2  ;;  %v432_v9 = vadd.f32 %v431_v7, %v254_v38  ;;  %v361_v10 = vadd.f32 %v360_v8, %v254_v38  ;;  %v433_v11 = vpop.f32.mrb[5].mxu1  ;;  %v362_v12 = vpop.f32.mrb[6].mxu0 }
 0x104   : > { %591 = vst [vmem:[%s1061_s19 + $0x18] sm:$0xff] %v744_v5  ;;  %v468_v13 = vmax.f32 %v359_v6, 0.0  ;;  %v434_v14 = vadd.f32 %v433_v11, %v254_v38  ;;  %v363_v15 = vadd.f32 %v362_v12, %v259_v3  ;;  %v435_v16 = vpop.f32.mrb[6].mxu1  ;;  %v364_v17 = vpop.f32.mrb[7].mxu0 }
 0x105   : > { %v470_v18 = vmax.f32 %v432_v9, 0.0  ;;  %v469_v19 = vmax.f32 %v361_v10, 0.0  ;;  %v436_v20 = vadd.f32 %v435_v16, %v259_v3  ;;  %v365_v21 = vadd.f32 %v364_v17, %v259_v3  ;;  %v437_v22 = vpop.f32.mrb[7].mxu1  ;;  %v279_v62 = vpop.permute.xlu1 %278 }
 0x106   : > { %v471_v23 = vmax.f32 %v434_v14, 0.0  ;;  %v472_v24 = vmax.f32 %v363_v15, 0.0  ;;  %v438_v25 = vadd.f32 %v437_v22, %v259_v3 }
 0x107   : > { %v745_v26 = vpack.c.bf16 %v469_v19, %v468_v13  ;;  %v474_v27 = vmax.f32 %v436_v20, 0.0  ;;  %v473_v28 = vmax.f32 %v365_v21, 0.0 }
 0x108   : > { %v746_v29 = vpack.c.bf16 %v471_v23, %v470_v18  ;;  %v475_v31 = vmax.f32 %v438_v25, 0.0 }
 0x109   : > { %592 = vst [vmem:[%s1061_s19 + $0x20] sm:$0xff] %v745_v26  ;;  %v747_v33 = vpack.c.bf16 %v473_v28, %v472_v24  ;;  %v368_v34 = vpop.f32.mrb[8].mxu0 }
 0x10a   : > { %593 = vst [vmem:[%s1061_s19 + $0x28] sm:$0xff] %v746_v29  ;;  %v748_v35 = vpack.c.bf16 %v475_v31, %v474_v27  ;;  %v369_v36 = vadd.f32 %v368_v34, %v264_v30  ;;  %v441_v37 = vpop.f32.mrb[8].mxu1  ;;  %v370_v38 = vpop.f32.mrb[9].mxu0 }
 0x10b   : > { %594 = vst [vmem:[%s1061_s19 + $0x30] sm:$0xff] %v747_v33  ;;  %v442_v39 = vadd.f32 %v441_v37, %v264_v30  ;;  %v371_v40 = vadd.f32 %v370_v38, %v264_v30  ;;  %v443_v41 = vpop.f32.mrb[9].mxu1  ;;  %v372_v42 = vpop.f32.mrb[10].mxu0 }
 0x10c   : > { %595 = vst [vmem:[%s1061_s19 + $0x38] sm:$0xff] %v748_v35  ;;  %v476_v43 = vmax.f32 %v369_v36, 0.0  ;;  %v444_v44 = vadd.f32 %v443_v41, %v264_v30  ;;  %v373_v45 = vadd.f32 %v372_v42, %v269_v32  ;;  %v445_v46 = vpop.f32.mrb[10].mxu1  ;;  %v374_v47 = vpop.f32.mrb[11].mxu0 }
 0x10d   : > { %v478_v48 = vmax.f32 %v442_v39, 0.0  ;;  %v477_v49 = vmax.f32 %v371_v40, 0.0  ;;  %v446_v50 = vadd.f32 %v445_v46, %v269_v32  ;;  %v375_v51 = vadd.f32 %v374_v47, %v269_v32  ;;  %v447_v52 = vpop.f32.mrb[11].mxu1 }
 0x10e   : > { %v479_v53 = vmax.f32 %v444_v44, 0.0  ;;  %v480_v54 = vmax.f32 %v373_v45, 0.0  ;;  %v448_v55 = vadd.f32 %v447_v52, %v269_v32 }
 0x10f   : > { %v749_v56 = vpack.c.bf16 %v477_v49, %v476_v43  ;;  %v482_v57 = vmax.f32 %v446_v50, 0.0  ;;  %v481_v58 = vmax.f32 %v375_v51, 0.0 }
 0x110   : > { %v750_v60 = vpack.c.bf16 %v479_v53, %v478_v48  ;;  %v483_v61 = vmax.f32 %v448_v55, 0.0 }
 0x111   : > { %596 = vst [vmem:[%s1061_s19 + $0x40] sm:$0xff] %v749_v56  ;;  %v751_v63 = vpack.c.bf16 %v481_v58, %v480_v54  ;;  %v378_v0 = vpop.f32.mrb[12].mxu0 }
 0x112   : > { %597 = vst [vmem:[%s1061_s19 + $0x48] sm:$0xff] %v750_v60  ;;  %v752_v1 = vpack.c.bf16 %v483_v61, %v482_v57  ;;  %v379_v2 = vadd.f32 %v378_v0, %v274_v59  ;;  %v451_v3 = vpop.f32.mrb[12].mxu1  ;;  %v380_v4 = vpop.f32.mrb[13].mxu0 }
 0x113   : > { %598 = vst [vmem:[%s1061_s19 + $0x50] sm:$0xff] %v751_v63  ;;  %v452_v5 = vadd.f32 %v451_v3, %v274_v59  ;;  %v381_v6 = vadd.f32 %v380_v4, %v274_v59  ;;  %v453_v7 = vpop.f32.mrb[13].mxu1  ;;  %v382_v8 = vpop.f32.mrb[14].mxu0 }
 0x114   : > { %599 = vst [vmem:[%s1061_s19 + $0x58] sm:$0xff] %v752_v1  ;;  %v484_v9 = vmax.f32 %v379_v2, 0.0  ;;  %v454_v10 = vadd.f32 %v453_v7, %v274_v59  ;;  %v383_v11 = vadd.f32 %v382_v8, %v279_v62  ;;  %v455_v12 = vpop.f32.mrb[14].mxu1  ;;  %v384_v13 = vpop.f32.mrb[15].mxu0 }
 0x115   : > { %v486_v14 = vmax.f32 %v452_v5, 0.0  ;;  %v485_v15 = vmax.f32 %v381_v6, 0.0  ;;  %v456_v16 = vadd.f32 %v455_v12, %v279_v62  ;;  %v385_v17 = vadd.f32 %v384_v13, %v279_v62  ;;  %v457_v18 = vpop.f32.mrb[15].mxu1 }
 0x116   : > { %v487_v19 = vmax.f32 %v454_v10, 0.0  ;;  %v488_v20 = vmax.f32 %v383_v11, 0.0  ;;  %v458_v21 = vadd.f32 %v457_v18, %v279_v62 }
 0x117   : > { %v753_v22 = vpack.c.bf16 %v485_v15, %v484_v9  ;;  %v490_v23 = vmax.f32 %v456_v16, 0.0  ;;  %v489_v24 = vmax.f32 %v385_v17, 0.0 }
 0x118   : > { %v754_v25 = vpack.c.bf16 %v487_v19, %v486_v14  ;;  %v491_v26 = vmax.f32 %v458_v21, 0.0 }
 0x119   : > { %600 = vst [vmem:[%s1061_s19 + $0x60] sm:$0xff] %v753_v22  ;;  %v755_v27 = vpack.c.bf16 %v489_v24, %v488_v20 }
 0x11a   : > { %601 = vst [vmem:[%s1061_s19 + $0x68] sm:$0xff] %v754_v25  ;;  %v756_v28 = vpack.c.bf16 %v491_v26, %v490_v23 }
 0x11b   : > { %602 = vst [vmem:[%s1061_s19 + $0x70] sm:$0xff] %v755_v27 }
 0x11c   : > { %603 = vst [vmem:[%s1061_s19 + $0x78] sm:$0xff] %v756_v28 }
 0x11d   : > { %835 = shalt.err (!%p832_p5)
}
 0x11e   : > { %s836_s6 = scalar_lea.hbm %s1081_s28, 2048  ;;  %s840_s9 = scalar_lea.hbm %s1139_s3, 4096 }
 0x11f   : > { %p837_p6 = scmp.ne.s32.totalorder %s1081_s28, %s836_s6  ;;  %p841_p10 = scmp.lt.u32.totalorder %s1081_s28, %s1139_s3 }
 0x120   : > { %p842_p11 = scmp.lt.u32.totalorder %s840_s9, %s836_s6  ;;  %p844_p13 = scmp.lt.u32.totalorder %s836_s6, %s1081_s28 }
 0x121   : > { %p838_p7 = pnand %p837_p6, %p966_p4 }
 0x122   : > { %p843_p12 = por %p842_p11, %p841_p10 }
 0x123   : > { %p839_p9 = pneg %p838_p7 }
 0x124   : > { %p845_p0 = por %p844_p13, %p843_p12 }
 0x126   : > { %p846_p1 = pnand %p845_p0, %p839_p9 }
 0x128   : > { %849 = shalt.err (!%p846_p1)
}
 0x129   : > { %s904_s18 = smov 256   ;;  %s905_s19 = smov 16  }
 0x12a   : > { %758 = dma.vmem_to_hbm [thread:$0]  (%p966_p4), %s1083_s23, 2048, %s1081_s28, %s1090_s15, %s904_s18, %s904_s18, %s905_s19  }
 0x12b PF: > { %p764_p2 = scmp.ge.s32.totalorder %s900_s17, 2  ;;  %s635_s21 = sand.u32 1, %s880_s12  }
 0x12c   : > { %s636_s26 = scalar_lea.sflag [#allocation3], %s635_s21 }
 0x12d   : > { %p761_p3 = pnand %p764_p2, %p973_p8 }
 0x12f   : > { %875 = dma.done.wait (!%p761_p3), %s636_s26, 2048  }
 0x130   : > { %877 = vsyncadd (!%p761_p3), %s636_s26, 4294965248  ;;  %s16_s17 = sadd.s32 1, %s900_s17   ;;  %s1142_s12 = smov %s884_s13 }
 0x131   : > { %p13_p5 = scmp.ge.s32.totalorder %s16_s17, 4   ;;  %s1143_s13 = smov %s888_s14 }
 0x132   : > { %s1144_s14 = smov %s979_s25  ;;  %s1145_s15 = smov %s896_s16 }
 0x133   : > { %s1146_s16 = smov %s1148_s20  ;;  %15 = sbr.rel (!%p13_p5) target bundleno = 4 (0x4), region = 67 }
 0x13a   :  { %641 = vsyncpa [#allocation3], 1 }
 0x13b   :  { %643 = vsyncpa [#allocation3 + $0x1], 1 }

</bundles_post_ra>
